<compile_context>
chip_gen: v6e
topology: v6e:2x2x1
jax: 0.10.0
libtpu: 0.0.40
codegen_flags: <defaults>
</compile_context>

<pallas_src>
import functools

import jax
import jax.numpy as jnp
import numpy as np
from jax.experimental import pallas as pl
from jax.experimental.pallas import tpu as pltpu


def _round_up(x, m):
    return ((x + m - 1) // m) * m


def _gate_kernel(t_ref, cr_ref, sr_ref, cw_ref, sw_ref, cv_ref, sv_ref,
                 wt_ref, wc_ref, ws_ref, b_ref, psm_ref,
                 or_ref, ow_ref, ov_ref, *, pack, dp):
    # Shared text contribution to all three branches' logits (one dot per tile).
    base = jnp.dot(t_ref[...], wt_ref[...],
                   preferred_element_type=jnp.float32) + b_ref[...]   # (tm, dp)
    wc = wc_ref[...]                                                   # (dp, dp)
    ws = ws_ref[...]                                                   # (dp, dp)
    if pack > 1:
        psm = psm_ref[...]   # (dp, 2*dp) 0/1: [group-first-logit bcast | group sum]

    def branch(c_ref, s_ref, out_ref):
        c = c_ref[...]                                  # (tm, dp) comet
        s = s_ref[...]                                  # (tm, dp) sbert
        # Linear(cat(text, comet, sbert)) logits: two K=dp dots on top of `base`.
        logits = (base
                  + jnp.dot(c, wc, preferred_element_type=jnp.float32)
                  + jnp.dot(s, ws, preferred_element_type=jnp.float32))
        m = jnp.max(logits, axis=-1, keepdims=True)     # row-max shift (XLU)
        e = jnp.exp(logits - m)
        if pack > 1:
            # Per-group softmax prob of index 0, broadcast within the group:
            # one MXU dot yields numerator and denominator side by side.
            ns = jnp.dot(e, psm, preferred_element_type=jnp.float32)
            num, denom = ns[:, :dp], ns[:, dp:]
        else:
            num = e[:, 0:1]
            denom = jnp.sum(e, axis=-1, keepdims=True)
        g = (num * pl.reciprocal(denom, approx=False)).astype(c.dtype)
        out_ref[...] = (s + g * (c - s)).astype(out_ref.dtype)

    branch(cr_ref, sr_ref, or_ref)
    branch(cw_ref, sw_ref, ow_ref)
    branch(cv_ref, sv_ref, ov_ref)


def gate_module(text_emb, xreact_comet, xwant_comet, xreact_sbert, xwant_sbert,
                xbefore, xafter, weight, bias, *, tm=1024):
    """Pallas forward of SHARK GateModule.

    weight: (D, 3D) torch nn.Linear weight (out=D, in=3D); bias: (D,).
    All sequence inputs: (B, S, D) with text_feat_dim == relation_feat_dim == D.
    tm: max packed-row tile. 1024 by default (fits v5e with the explicit VMEM
        limit below); v6e/v7x can take 2048.
    """
    B, S, D = text_emb.shape
    dtype = text_emb.dtype
    M = B * S

    # Lane packing: put `pack` consecutive rows side by side on the 128-lane axis.
    pack = 128 // D if (D <= 128 and 128 % D == 0) else 1
    dp = pack * D

    # Pad rows only to a multiple of 8*pack (sublane-aligned packed view).
    # The row tile does NOT have to divide mp: the tail grid block is partial.
    row_align = 8 * pack
    m_pad = _round_up(M, row_align)
    mp = m_pad // pack                                  # packed rows (multiple of 8)

    def prep(x):                                        # (B, S, D) -> (mp, dp)
        x = x.reshape(M, D)
        if m_pad != M:                                  # small copy only if needed
            x = jnp.pad(x, ((0, m_pad - M), (0, 0)))
        return x.reshape(mp, dp)

    t_pk = prep(text_emb)
    c_r, s_r = prep(xreact_comet), prep(xreact_sbert)
    c_w, s_w = prep(xwant_comet), prep(xwant_sbert)
    c_v, s_v = prep(xbefore), prep(xafter)

    # Row tile: at least two grid steps whenever the problem is big enough to
    # split (keeps both v7x TensorCores busy), capped at tm.
    tm_eff = min(_round_up(tm, 8), max(8, _round_up(pl.cdiv(mp, 2), 8)))
    grid_m = pl.cdiv(mp, tm_eff)

    # Linear(3D -> D) split per input and block-diagonalised for the packed layout.
    wT = weight.T.astype(dtype)                         # (3D, D)
    w_t, w_c, w_s = wT[:D], wT[D:2 * D], wT[2 * D:]
    eye_p = jnp.eye(pack, dtype=dtype)
    bd = lambda a: jnp.kron(eye_p, a)                   # (dp, dp) block-diagonal
    wt_bd, wc_bd, ws_bd = bd(w_t), bd(w_c), bd(w_s)
    b_pk = jnp.tile(bias.astype(jnp.float32), pack).reshape(1, dp)

    # Fused 0/1 constant implementing the per-group softmax on the MXU:
    #   e @ psm = [ e[group first lane] bcast over group | sum(e) over group bcast ].
    if pack > 1:
        f32 = jnp.float32
        sel0 = jnp.zeros((D, D), f32).at[0, :].set(1.0)
        pm = jnp.kron(jnp.eye(pack, dtype=f32), sel0)                     # (dp, dp)
        sm = jnp.kron(jnp.eye(pack, dtype=f32), jnp.ones((D, D), f32))    # (dp, dp)
        psm = jnp.concatenate([pm, sm], axis=-1)                          # (dp, 2*dp)
    else:
        psm = jnp.zeros((8, 128), jnp.float32)          # unused placeholder

    kernel = functools.partial(_gate_kernel, pack=pack, dp=dp)
    row = lambda: pl.BlockSpec((tm_eff, dp), lambda i: (i, 0))
    const = lambda a: pl.BlockSpec(a.shape, lambda i: (0,) * a.ndim)

    outs = pl.pallas_call(
        kernel,
        out_shape=tuple(jax.ShapeDtypeStruct((mp, dp), dtype) for _ in range(3)),
        grid_spec=pltpu.PrefetchScalarGridSpec(
            num_scalar_prefetch=0,
            grid=(grid_m,),
            in_specs=[row(), row(), row(), row(), row(), row(), row(),
                      const(wt_bd), const(wc_bd), const(ws_bd),
                      const(b_pk), const(psm)],
            out_specs=[row(), row(), row()],
        ),
        compiler_params=pltpu.CompilerParams(
            dimension_semantics=("parallel",),
            vmem_limit_bytes=48 * 1024 * 1024),
    )(t_pk, c_r, s_r, c_w, s_w, c_v, s_v, wt_bd, wc_bd, ws_bd, b_pk, psm)

    def unpack(o):                                      # (mp, dp) -> (B, S, D)
        o = o.reshape(m_pad, D)
        if m_pad != M:
            o = o[:M]
        return o.reshape(B, S, D)

    return tuple(unpack(o) for o in outs)


def gate_module_ref(text, rc, wc, rs, ws, before, after, weight, bias):
    hi = jax.lax.Precision.HIGHEST
    def branch(c, s):
        cat = jnp.concatenate([text, c, s], axis=-1)
        logits = jnp.dot(cat, weight.T, precision=hi) + bias
        g = jax.nn.softmax(logits, axis=-1)[..., 0:1]
        return g * c + (1.0 - g) * s
    return branch(rc, rs), branch(wc, ws), branch(before, after)


if __name__ == "__main__":
    def run_case(B, S, D, key, tm=1024):
        ks = jax.random.split(key, 9)
        mk = lambda k: jax.random.normal(k, (B, S, D), jnp.float32)
        text, r_comet, w_comet, r_sbert, w_sbert, before, after = (
            mk(k) for k in ks[:7])
        weight = jax.random.normal(ks[7], (D, 3 * D), jnp.float32) / np.sqrt(3 * D)
        bias = jax.random.normal(ks[8], (D,), jnp.float32) * 0.01

        outs = gate_module(text, r_comet, w_comet, r_sbert, w_sbert,
                           before, after, weight, bias, tm=tm)
        outs = jax.block_until_ready(outs)

        refs = gate_module_ref(text, r_comet, w_comet, r_sbert, w_sbert,
                               before, after, weight, bias)
        # Tolerance covers the single-pass bf16 MXU dots used for the logits/gate.
        for o, r in zip(outs, refs):
            np.testing.assert_allclose(np.asarray(o), np.asarray(r),
                                       rtol=2e-2, atol=2e-2)

    keys = jax.random.split(jax.random.PRNGKey(0), 2)
    run_case(2, 8, 32, keys[0])    # tiny: single grid step
    run_case(2, 80, 32, keys[1])   # multi-step grid with a partial tail block
    print("KERNEL_OK")
</pallas_src>

<mosaic_0001>
module attributes {stable_mosaic.version = 11 : i64} {
  func.func @_gate_kernel(%arg0: i32, %arg1: memref<8x128xf32, #tpu.memory_space<vmem>>, %arg2: memref<8x128xf32, #tpu.memory_space<vmem>>, %arg3: memref<8x128xf32, #tpu.memory_space<vmem>>, %arg4: memref<8x128xf32, #tpu.memory_space<vmem>>, %arg5: memref<8x128xf32, #tpu.memory_space<vmem>>, %arg6: memref<8x128xf32, #tpu.memory_space<vmem>>, %arg7: memref<8x128xf32, #tpu.memory_space<vmem>>, %arg8: memref<128x128xf32, #tpu.memory_space<vmem>>, %arg9: memref<128x128xf32, #tpu.memory_space<vmem>>, %arg10: memref<128x128xf32, #tpu.memory_space<vmem>>, %arg11: memref<1x128xf32, #tpu.memory_space<vmem>>, %arg12: memref<128x256xf32, #tpu.memory_space<vmem>>, %arg13: memref<8x128xf32, #tpu.memory_space<vmem>>, %arg14: memref<8x128xf32, #tpu.memory_space<vmem>>, %arg15: memref<8x128xf32, #tpu.memory_space<vmem>>) attributes {dimension_semantics = [#tpu.dimension_semantics<parallel>], iteration_bounds = array<i64: 1>, scalar_prefetch = 0 : i64, scratch_operands = 0 : i64, tpu.core_type = #tpu.core_type<tc>, window_params = [{transform_indices = @transform_0, window_bounds = array<i64: 8, 128>}, {transform_indices = @transform_1, window_bounds = array<i64: 8, 128>}, {transform_indices = @transform_2, window_bounds = array<i64: 8, 128>}, {transform_indices = @transform_3, window_bounds = array<i64: 8, 128>}, {transform_indices = @transform_4, window_bounds = array<i64: 8, 128>}, {transform_indices = @transform_5, window_bounds = array<i64: 8, 128>}, {transform_indices = @transform_6, window_bounds = array<i64: 8, 128>}, {pipeline_mode = #tpu.pipeline_mode<synchronous>, transform_indices = @transform_7, window_bounds = array<i64: 128, 128>}, {pipeline_mode = #tpu.pipeline_mode<synchronous>, transform_indices = @transform_8, window_bounds = array<i64: 128, 128>}, {pipeline_mode = #tpu.pipeline_mode<synchronous>, transform_indices = @transform_9, window_bounds = array<i64: 128, 128>}, {pipeline_mode = #tpu.pipeline_mode<synchronous>, transform_indices = @transform_10, window_bounds = array<i64: 1, 128>}, {pipeline_mode = #tpu.pipeline_mode<synchronous>, transform_indices = @transform_11, window_bounds = array<i64: 128, 256>}, {transform_indices = @transform_12, window_bounds = array<i64: 8, 128>}, {transform_indices = @transform_13, window_bounds = array<i64: 8, 128>}, {transform_indices = @transform_14, window_bounds = array<i64: 8, 128>}]} {
    %c0 = arith.constant 0 : index
    %c0_0 = arith.constant 0 : index
    %0 = vector.load %arg1[%c0, %c0_0] : memref<8x128xf32, #tpu.memory_space<vmem>>, vector<8x128xf32>
    %c0_1 = arith.constant 0 : index
    %c0_2 = arith.constant 0 : index
    %1 = vector.load %arg8[%c0_1, %c0_2] : memref<128x128xf32, #tpu.memory_space<vmem>>, vector<128x128xf32>
    %cst = arith.constant dense<0.000000e+00> : vector<8x128xf32>
    %2 = tpu.matmul %0, %1, %cst {dimension_numbers = #tpu.dot_dimension_numbers<[1], [0], [0], [1], [0, 0, 1, 1], [], []>} : vector<8x128xf32>, vector<128x128xf32>, vector<8x128xf32> -> vector<8x128xf32>
    %c0_3 = arith.constant 0 : index
    %c0_4 = arith.constant 0 : index
    %3 = vector.load %arg11[%c0_3, %c0_4] : memref<1x128xf32, #tpu.memory_space<vmem>>, vector<1x128xf32>
    %4 = vector.broadcast %3 : vector<1x128xf32> to vector<8x128xf32>
    %5 = arith.addf %2, %4 : vector<8x128xf32>
    %c0_5 = arith.constant 0 : index
    %c0_6 = arith.constant 0 : index
    %6 = vector.load %arg9[%c0_5, %c0_6] : memref<128x128xf32, #tpu.memory_space<vmem>>, vector<128x128xf32>
    %c0_7 = arith.constant 0 : index
    %c0_8 = arith.constant 0 : index
    %7 = vector.load %arg10[%c0_7, %c0_8] : memref<128x128xf32, #tpu.memory_space<vmem>>, vector<128x128xf32>
    %c0_9 = arith.constant 0 : index
    %c0_10 = arith.constant 0 : index
    %8 = vector.load %arg12[%c0_9, %c0_10] : memref<128x256xf32, #tpu.memory_space<vmem>>, vector<128x256xf32>
    %c0_11 = arith.constant 0 : index
    %c0_12 = arith.constant 0 : index
    %9 = vector.load %arg2[%c0_11, %c0_12] : memref<8x128xf32, #tpu.memory_space<vmem>>, vector<8x128xf32>
    %c0_13 = arith.constant 0 : index
    %c0_14 = arith.constant 0 : index
    %10 = vector.load %arg3[%c0_13, %c0_14] : memref<8x128xf32, #tpu.memory_space<vmem>>, vector<8x128xf32>
    %cst_15 = arith.constant dense<0.000000e+00> : vector<8x128xf32>
    %11 = tpu.matmul %9, %6, %cst_15 {dimension_numbers = #tpu.dot_dimension_numbers<[1], [0], [0], [1], [0, 0, 1, 1], [], []>} : vector<8x128xf32>, vector<128x128xf32>, vector<8x128xf32> -> vector<8x128xf32>
    %12 = arith.addf %5, %11 : vector<8x128xf32>
    %cst_16 = arith.constant dense<0.000000e+00> : vector<8x128xf32>
    %13 = tpu.matmul %10, %7, %cst_16 {dimension_numbers = #tpu.dot_dimension_numbers<[1], [0], [0], [1], [0, 0, 1, 1], [], []>} : vector<8x128xf32>, vector<128x128xf32>, vector<8x128xf32> -> vector<8x128xf32>
    %14 = arith.addf %12, %13 : vector<8x128xf32>
    %cst_17 = arith.constant dense<0xFF800000> : vector<8xf32>
    %15 = vector.multi_reduction <maximumf>, %14, %cst_17 [1] : vector<8x128xf32> to vector<8xf32>
    %16 = vector.shape_cast %15 : vector<8xf32> to vector<8x1xf32>
    %17 = vector.broadcast %16 : vector<8x1xf32> to vector<8x128xf32>
    %18 = arith.subf %14, %17 : vector<8x128xf32>
    %19 = math.exp %18 : vector<8x128xf32>
    %cst_18 = arith.constant dense<0.000000e+00> : vector<8x256xf32>
    %20 = tpu.matmul %19, %8, %cst_18 {dimension_numbers = #tpu.dot_dimension_numbers<[1], [0], [0], [1], [0, 0, 1, 1], [], []>} : vector<8x128xf32>, vector<128x256xf32>, vector<8x256xf32> -> vector<8x256xf32>
    %21 = vector.extract_strided_slice %20 {offsets = [0, 0], sizes = [8, 128], strides = [1, 1]} : vector<8x256xf32> to vector<8x128xf32>
    %22 = vector.extract_strided_slice %20 {offsets = [0, 128], sizes = [8, 128], strides = [1, 1]} : vector<8x256xf32> to vector<8x128xf32>
    %23 = tpu.reciprocal %22 : vector<8x128xf32> -> vector<8x128xf32>
    %24 = arith.mulf %21, %23 : vector<8x128xf32>
    %25 = arith.subf %9, %10 : vector<8x128xf32>
    %26 = arith.mulf %24, %25 : vector<8x128xf32>
    %27 = arith.addf %10, %26 : vector<8x128xf32>
    %c0_19 = arith.constant 0 : index
    %c0_20 = arith.constant 0 : index
    %28 = vector.load %arg13[%c0_19, %c0_20] : memref<8x128xf32, #tpu.memory_space<vmem>>, vector<8x128xf32>
    tpu.vector_store %arg13[%c0_19, %c0_20], %27 {strides = array<i32>} : memref<8x128xf32, #tpu.memory_space<vmem>>, vector<8x128xf32>,
    %c0_21 = arith.constant 0 : index
    %c0_22 = arith.constant 0 : index
    %29 = vector.load %arg4[%c0_21, %c0_22] : memref<8x128xf32, #tpu.memory_space<vmem>>, vector<8x128xf32>
    %c0_23 = arith.constant 0 : index
    %c0_24 = arith.constant 0 : index
    %30 = vector.load %arg5[%c0_23, %c0_24] : memref<8x128xf32, #tpu.memory_space<vmem>>, vector<8x128xf32>
    %cst_25 = arith.constant dense<0.000000e+00> : vector<8x128xf32>
    %31 = tpu.matmul %29, %6, %cst_25 {dimension_numbers = #tpu.dot_dimension_numbers<[1], [0], [0], [1], [0, 0, 1, 1], [], []>} : vector<8x128xf32>, vector<128x128xf32>, vector<8x128xf32> -> vector<8x128xf32>
    %32 = arith.addf %5, %31 : vector<8x128xf32>
    %cst_26 = arith.constant dense<0.000000e+00> : vector<8x128xf32>
    %33 = tpu.matmul %30, %7, %cst_26 {dimension_numbers = #tpu.dot_dimension_numbers<[1], [0], [0], [1], [0, 0, 1, 1], [], []>} : vector<8x128xf32>, vector<128x128xf32>, vector<8x128xf32> -> vector<8x128xf32>
    %34 = arith.addf %32, %33 : vector<8x128xf32>
    %cst_27 = arith.constant dense<0xFF800000> : vector<8xf32>
    %35 = vector.multi_reduction <maximumf>, %34, %cst_27 [1] : vector<8x128xf32> to vector<8xf32>
    %36 = vector.shape_cast %35 : vector<8xf32> to vector<8x1xf32>
    %37 = vector.broadcast %36 : vector<8x1xf32> to vector<8x128xf32>
    %38 = arith.subf %34, %37 : vector<8x128xf32>
    %39 = math.exp %38 : vector<8x128xf32>
    %cst_28 = arith.constant dense<0.000000e+00> : vector<8x256xf32>
    %40 = tpu.matmul %39, %8, %cst_28 {dimension_numbers = #tpu.dot_dimension_numbers<[1], [0], [0], [1], [0, 0, 1, 1], [], []>} : vector<8x128xf32>, vector<128x256xf32>, vector<8x256xf32> -> vector<8x256xf32>
    %41 = vector.extract_strided_slice %40 {offsets = [0, 0], sizes = [8, 128], strides = [1, 1]} : vector<8x256xf32> to vector<8x128xf32>
    %42 = vector.extract_strided_slice %40 {offsets = [0, 128], sizes = [8, 128], strides = [1, 1]} : vector<8x256xf32> to vector<8x128xf32>
    %43 = tpu.reciprocal %42 : vector<8x128xf32> -> vector<8x128xf32>
    %44 = arith.mulf %41, %43 : vector<8x128xf32>
    %45 = arith.subf %29, %30 : vector<8x128xf32>
    %46 = arith.mulf %44, %45 : vector<8x128xf32>
    %47 = arith.addf %30, %46 : vector<8x128xf32>
    %c0_29 = arith.constant 0 : index
    %c0_30 = arith.constant 0 : index
    %48 = vector.load %arg14[%c0_29, %c0_30] : memref<8x128xf32, #tpu.memory_space<vmem>>, vector<8x128xf32>
    tpu.vector_store %arg14[%c0_29, %c0_30], %47 {strides = array<i32>} : memref<8x128xf32, #tpu.memory_space<vmem>>, vector<8x128xf32>,
    %c0_31 = arith.constant 0 : index
    %c0_32 = arith.constant 0 : index
    %49 = vector.load %arg6[%c0_31, %c0_32] : memref<8x128xf32, #tpu.memory_space<vmem>>, vector<8x128xf32>
    %c0_33 = arith.constant 0 : index
    %c0_34 = arith.constant 0 : index
    %50 = vector.load %arg7[%c0_33, %c0_34] : memref<8x128xf32, #tpu.memory_space<vmem>>, vector<8x128xf32>
    %cst_35 = arith.constant dense<0.000000e+00> : vector<8x128xf32>
    %51 = tpu.matmul %49, %6, %cst_35 {dimension_numbers = #tpu.dot_dimension_numbers<[1], [0], [0], [1], [0, 0, 1, 1], [], []>} : vector<8x128xf32>, vector<128x128xf32>, vector<8x128xf32> -> vector<8x128xf32>
    %52 = arith.addf %5, %51 : vector<8x128xf32>
    %cst_36 = arith.constant dense<0.000000e+00> : vector<8x128xf32>
    %53 = tpu.matmul %50, %7, %cst_36 {dimension_numbers = #tpu.dot_dimension_numbers<[1], [0], [0], [1], [0, 0, 1, 1], [], []>} : vector<8x128xf32>, vector<128x128xf32>, vector<8x128xf32> -> vector<8x128xf32>
    %54 = arith.addf %52, %53 : vector<8x128xf32>
    %cst_37 = arith.constant dense<0xFF800000> : vector<8xf32>
    %55 = vector.multi_reduction <maximumf>, %54, %cst_37 [1] : vector<8x128xf32> to vector<8xf32>
    %56 = vector.shape_cast %55 : vector<8xf32> to vector<8x1xf32>
    %57 = vector.broadcast %56 : vector<8x1xf32> to vector<8x128xf32>
    %58 = arith.subf %54, %57 : vector<8x128xf32>
    %59 = math.exp %58 : vector<8x128xf32>
    %cst_38 = arith.constant dense<0.000000e+00> : vector<8x256xf32>
    %60 = tpu.matmul %59, %8, %cst_38 {dimension_numbers = #tpu.dot_dimension_numbers<[1], [0], [0], [1], [0, 0, 1, 1], [], []>} : vector<8x128xf32>, vector<128x256xf32>, vector<8x256xf32> -> vector<8x256xf32>
    %61 = vector.extract_strided_slice %60 {offsets = [0, 0], sizes = [8, 128], strides = [1, 1]} : vector<8x256xf32> to vector<8x128xf32>
    %62 = vector.extract_strided_slice %60 {offsets = [0, 128], sizes = [8, 128], strides = [1, 1]} : vector<8x256xf32> to vector<8x128xf32>
    %63 = tpu.reciprocal %62 : vector<8x128xf32> -> vector<8x128xf32>
    %64 = arith.mulf %61, %63 : vector<8x128xf32>
    %65 = arith.subf %49, %50 : vector<8x128xf32>
    %66 = arith.mulf %64, %65 : vector<8x128xf32>
    %67 = arith.addf %50, %66 : vector<8x128xf32>
    %c0_39 = arith.constant 0 : index
    %c0_40 = arith.constant 0 : index
    %68 = vector.load %arg15[%c0_39, %c0_40] : memref<8x128xf32, #tpu.memory_space<vmem>>, vector<8x128xf32>
    tpu.vector_store %arg15[%c0_39, %c0_40], %67 {strides = array<i32>} : memref<8x128xf32, #tpu.memory_space<vmem>>, vector<8x128xf32>,
    return
  }
  func.func @transform_0(%arg0: i32) -> (i32, i32) {
    %c0_i32 = arith.constant 0 : i32
    %c0_i32_0 = arith.constant 0 : i32
    return %arg0, %c0_i32 : i32, i32
  }
  func.func @transform_1(%arg0: i32) -> (i32, i32) {
    %c0_i32 = arith.constant 0 : i32
    %c0_i32_0 = arith.constant 0 : i32
    return %arg0, %c0_i32 : i32, i32
  }
  func.func @transform_2(%arg0: i32) -> (i32, i32) {
    %c0_i32 = arith.constant 0 : i32
    %c0_i32_0 = arith.constant 0 : i32
    return %arg0, %c0_i32 : i32, i32
  }
  func.func @transform_3(%arg0: i32) -> (i32, i32) {
    %c0_i32 = arith.constant 0 : i32
    %c0_i32_0 = arith.constant 0 : i32
    return %arg0, %c0_i32 : i32, i32
  }
  func.func @transform_4(%arg0: i32) -> (i32, i32) {
    %c0_i32 = arith.constant 0 : i32
    %c0_i32_0 = arith.constant 0 : i32
    return %arg0, %c0_i32 : i32, i32
  }
  func.func @transform_5(%arg0: i32) -> (i32, i32) {
    %c0_i32 = arith.constant 0 : i32
    %c0_i32_0 = arith.constant 0 : i32
    return %arg0, %c0_i32 : i32, i32
  }
  func.func @transform_6(%arg0: i32) -> (i32, i32) {
    %c0_i32 = arith.constant 0 : i32
    %c0_i32_0 = arith.constant 0 : i32
    return %arg0, %c0_i32 : i32, i32
  }
  func.func @transform_7(%arg0: i32) -> (i32, i32) {
    %c0_i32 = arith.constant 0 : i32
    %c0_i32_0 = arith.constant 0 : i32
    %c0_i32_1 = arith.constant 0 : i32
    return %c0_i32, %c0_i32_0 : i32, i32
  }
  func.func @transform_8(%arg0: i32) -> (i32, i32) {
    %c0_i32 = arith.constant 0 : i32
    %c0_i32_0 = arith.constant 0 : i32
    %c0_i32_1 = arith.constant 0 : i32
    return %c0_i32, %c0_i32_0 : i32, i32
  }
  func.func @transform_9(%arg0: i32) -> (i32, i32) {
    %c0_i32 = arith.constant 0 : i32
    %c0_i32_0 = arith.constant 0 : i32
    %c0_i32_1 = arith.constant 0 : i32
    return %c0_i32, %c0_i32_0 : i32, i32
  }
  func.func @transform_10(%arg0: i32) -> (i32, i32) {
    %c0_i32 = arith.constant 0 : i32
    %c0_i32_0 = arith.constant 0 : i32
    %c0_i32_1 = arith.constant 0 : i32
    return %c0_i32, %c0_i32_0 : i32, i32
  }
  func.func @transform_11(%arg0: i32) -> (i32, i32) {
    %c0_i32 = arith.constant 0 : i32
    %c0_i32_0 = arith.constant 0 : i32
    %c0_i32_1 = arith.constant 0 : i32
    return %c0_i32, %c0_i32_0 : i32, i32
  }
  func.func @transform_12(%arg0: i32) -> (i32, i32) {
    %c0_i32 = arith.constant 0 : i32
    %c0_i32_0 = arith.constant 0 : i32
    return %arg0, %c0_i32 : i32, i32
  }
  func.func @transform_13(%arg0: i32) -> (i32, i32) {
    %c0_i32 = arith.constant 0 : i32
    %c0_i32_0 = arith.constant 0 : i32
    return %arg0, %c0_i32 : i32, i32
  }
  func.func @transform_14(%arg0: i32) -> (i32, i32) {
    %c0_i32 = arith.constant 0 : i32
    %c0_i32_0 = arith.constant 0 : i32
    return %arg0, %c0_i32 : i32, i32
  }
}

</mosaic_0001>

<bundles_post_ra>
// kernel: tpu_custom_call.1
= control target key start
LH: loop header
LB: loop body
LE: loop exit
PB: predicated region body
PF: predicated region fallthrough
CT: control target
= control target key end

     0   :  { %20 = vsyncpa [#allocation3], 0  ;;  %s2352_s0 = inlined_call_operand.hbm [shape: f32[8,128], index: 0, kind: input, shape index: {}]   ;;  %s2353_s1 = inlined_call_operand.hbm [shape: f32[8,128], index: 1, kind: input, shape index: {}]   ;;  %s2354_s2 = inlined_call_operand.hbm [shape: f32[8,128], index: 2, kind: input, shape index: {}]   ;;  %s2355_s3 = inlined_call_operand.hbm [shape: f32[8,128], index: 3, kind: input, shape index: {}]   ;;  %s2356_s4 = inlined_call_operand.hbm [shape: f32[8,128], index: 4, kind: input, shape index: {}]   ;;  %s2357_s5 = inlined_call_operand.vmem [shape: f32[8,128], index: 5, kind: input, shape index: {}]   ;;  %s2358_s6 = inlined_call_operand.hbm [shape: f32[8,128], index: 6, kind: input, shape index: {}]   ;;  %s2359_s7 = inlined_call_operand.hbm [shape: f32[128,128], index: 7, kind: input, shape index: {}]   ;;  %s2360_s8 = inlined_call_operand.hbm [shape: f32[128,128], index: 8, kind: input, shape index: {}]   ;;  %s2361_s9 = inlined_call_operand.hbm [shape: f32[128,128], index: 9, kind: input, shape index: {}]   ;;  %s2362_s10 = inlined_call_operand.vmem [shape: f32[1,128], index: 10, kind: input, shape index: {}]   ;;  %s2363_s11 = inlined_call_operand.hbm [shape: f32[128,256], index: 11, kind: input, shape index: {}]   ;;  %s2364_s12 = inlined_call_operand.hbm [shape: f32[8,128], index: 12, kind: output, shape index: {0}]   ;;  %s2365_s13 = inlined_call_operand.hbm [shape: f32[8,128], index: 13, kind: output, shape index: {1}]   ;;  %s2366_s14 = inlined_call_operand.hbm [shape: f32[8,128], index: 14, kind: output, shape index: {2}]  }
   0x1   :  { %21 = vsyncpa [#allocation6], 0 }
   0x2   :  { %22 = vsyncpa [#allocation9], 0 }
   0x3   :  { %23 = vsyncpa [#allocation12], 0 }
   0x4   :  { %24 = vsyncpa [#allocation15], 0 }
   0x5   :  { %25 = vsyncpa [#allocation18], 0 }
   0x6   :  { %26 = vsyncpa [#allocation4], 0 }
   0x7   :  { %27 = vsyncpa [#allocation21], 0  ;;  %s1725_s29 = smov [#allocation5]   ;;  %s1726_s15 = smov [#allocation8]  }
   0x8   :  { %s44_s30 = sshll.u32 %s1725_s29, 4  ;;  %s64_s16 = sshll.u32 %s1726_s15, 4  ;;  %s45_s30 = int_to_ptr.vmem [resolvable:$true] %s44_s30  ;;  %s65_s16 = int_to_ptr.vmem [resolvable:$true] %s64_s16 }
   0x9   :  { %s1457_s17 = scalar_lea.vmem %s45_s30, 128  ;;  %p1462_p1 = scmp.lt.s32.totalorder %s45_s30, %s45_s30 }
   0xa   :  { %p1458_p0 = scmp.ne.s32.totalorder %s45_s30, %s1457_s17  ;;  %p1463_p2 = scmp.lt.s32.totalorder %s1457_s17, %s1457_s17 }
   0xc   :  { %p1464_p3 = por %p1463_p2, %p1462_p1 }
   0xe   :  { %p1465_p4 = pnand %p1464_p3, %p1458_p0 }
  0x10   :  { %1468 = shalt.err (!%p1465_p4)
}
  0x11   :  { %47 = dma.hbm_to_vmem [thread:$0]  %s2353_s1, 128, %s45_s30, [#allocation6]  }
  0x12   :  { %s1477_s20 = scalar_lea.vmem %s65_s16, 128  ;;  %p1482_p6 = scmp.lt.s32.totalorder %s65_s16, %s65_s16 }
  0x13   :  { %p1478_p5 = scmp.ne.s32.totalorder %s65_s16, %s1477_s20  ;;  %p1483_p7 = scmp.lt.s32.totalorder %s1477_s20, %s1477_s20 }
  0x15   :  { %p1484_p8 = por %p1483_p7, %p1482_p6 }
  0x17   :  { %p1485_p9 = pnand %p1484_p8, %p1478_p5 }
  0x19   :  { %1488 = shalt.err (!%p1485_p9)
}
  0x1a   :  { %67 = dma.hbm_to_vmem [thread:$0]  %s2355_s3, 128, %s65_s16, [#allocation9]  }
  0x1b   :  { %s1727_s23 = smov [#allocation11]  }
  0x1c   :  { %s86_s24 = sshll.u32 %s1727_s23, 4  ;;  %s87_s24 = int_to_ptr.vmem [resolvable:$true] %s86_s24 }
  0x1d   :  { %s1497_s25 = scalar_lea.vmem %s87_s24, 128  ;;  %p1502_p11 = scmp.lt.s32.totalorder %s87_s24, %s87_s24 }
  0x1e   :  { %p1498_p10 = scmp.ne.s32.totalorder %s87_s24, %s1497_s25  ;;  %p1503_p12 = scmp.lt.s32.totalorder %s1497_s25, %s1497_s25 }
  0x20   :  { %p1504_p13 = por %p1503_p12, %p1502_p11 }
  0x22   :  { %p1505_p0 = pnand %p1504_p13, %p1498_p10 }
  0x24   :  { %1508 = shalt.err (!%p1505_p0)
}
  0x25   :  { %89 = dma.hbm_to_vmem [thread:$0]  %s2358_s6, 128, %s87_s24, [#allocation12]  }
  0x26   :  { %s1728_s27 = smov [#allocation14]   ;;  %s1729_s29 = smov [#allocation2]  }
  0x27   :  { %s107_s28 = sshll.u32 %s1728_s27, 4  ;;  %s34_s30 = sshll.u32 %s1729_s29, 4  ;;  %s108_s28 = int_to_ptr.vmem [resolvable:$true] %s107_s28  ;;  %s35_s30 = int_to_ptr.vmem [resolvable:$true] %s34_s30 }
  0x28   :  { %s1517_s3 = scalar_lea.vmem %s108_s28, 2048  ;;  %p1522_p2 = scmp.lt.s32.totalorder %s108_s28, %s108_s28 }
  0x29   :  { %p1518_p1 = scmp.ne.s32.totalorder %s108_s28, %s1517_s3  ;;  %p1523_p3 = scmp.lt.s32.totalorder %s1517_s3, %s1517_s3 }
  0x2b   :  { %p1524_p4 = por %p1523_p3, %p1522_p2 }
  0x2d   :  { %p1525_p5 = pnand %p1524_p4, %p1518_p1 }
  0x2f   :  { %1528 = shalt.err (!%p1525_p5)
}
  0x30   :  { %s1730_s15 = smov 128   ;;  %s1731_s16 = smov 8  }
  0x31   :  { %113 = dma.hbm_to_vmem [thread:$0]  %s2360_s8, 2048, %s108_s28, [#allocation15], %s1730_s15, %s1730_s15, %s1731_s16  }
  0x32   :  { %s1537_s6 = scalar_lea.vmem %s35_s30, 128  ;;  %p1542_p7 = scmp.lt.s32.totalorder %s35_s30, %s35_s30 }
  0x33   :  { %p1538_p6 = scmp.ne.s32.totalorder %s35_s30, %s1537_s6  ;;  %p1543_p8 = scmp.lt.s32.totalorder %s1537_s6, %s1537_s6 }
  0x35   :  { %p1544_p9 = por %p1543_p8, %p1542_p7 }
  0x37   :  { %p1545_p10 = pnand %p1544_p9, %p1538_p6 }
  0x39   :  { %1548 = shalt.err (!%p1545_p10)
}
  0x3a   :  { %37 = dma.hbm_to_vmem [thread:$0]  %s2352_s0, 128, %s35_s30, [#allocation3]  }
  0x3b   :  { %s1732_s21 = smov [#allocation7]   ;;  %s1733_s23 = smov [#allocation10]  }
  0x3c   :  { %s54_s22 = sshll.u32 %s1732_s21, 4  ;;  %s74_s24 = sshll.u32 %s1733_s23, 4  ;;  %s55_s22 = int_to_ptr.vmem [resolvable:$true] %s54_s22  ;;  %s75_s24 = int_to_ptr.vmem [resolvable:$true] %s74_s24 }
  0x3d   :  { %s1557_s25 = scalar_lea.vmem %s55_s22, 128  ;;  %p1562_p12 = scmp.lt.s32.totalorder %s55_s22, %s55_s22 }
  0x3e   :  { %p1558_p11 = scmp.ne.s32.totalorder %s55_s22, %s1557_s25  ;;  %p1563_p13 = scmp.lt.s32.totalorder %s1557_s25, %s1557_s25 }
  0x40   :  { %p1564_p0 = por %p1563_p13, %p1562_p12 }
  0x42   :  { %p1565_p1 = pnand %p1564_p0, %p1558_p11 }
  0x44   :  { %1568 = shalt.err (!%p1565_p1)
}
  0x45   :  { %57 = dma.hbm_to_vmem [thread:$0]  %s2354_s2, 128, %s55_s22, [#allocation6]  }
  0x46   :  { %s1577_s26 = scalar_lea.vmem %s75_s24, 128  ;;  %p1582_p3 = scmp.lt.s32.totalorder %s75_s24, %s75_s24 }
  0x47   :  { %p1578_p2 = scmp.ne.s32.totalorder %s75_s24, %s1577_s26  ;;  %p1583_p4 = scmp.lt.s32.totalorder %s1577_s26, %s1577_s26 }
  0x49   :  { %p1584_p5 = por %p1583_p4, %p1582_p3 }
  0x4b   :  { %p1585_p6 = pnand %p1584_p5, %p1578_p2 }
  0x4d   :  { %1588 = shalt.err (!%p1585_p6)
}
  0x4e   :  { %77 = dma.hbm_to_vmem [thread:$0]  %s2356_s4, 128, %s75_s24, [#allocation9]  }
  0x4f   :  { %s1734_s28 = smov [#allocation13]   ;;  %s1735_s30 = smov [#allocation16]  }
  0x50   :  { %s95_s29 = sshll.u32 %s1734_s28, 4  ;;  %s119_s3 = sshll.u32 %s1735_s30, 4  ;;  %s96_s29 = int_to_ptr.vmem [resolvable:$true] %s95_s29  ;;  %s120_s3 = int_to_ptr.vmem [resolvable:$true] %s119_s3 }
  0x51   :  { %s1597_s17 = scalar_lea.vmem %s96_s29, 2048  ;;  %p1602_p8 = scmp.lt.s32.totalorder %s96_s29, %s96_s29 }
  0x52   :  { %p1598_p7 = scmp.ne.s32.totalorder %s96_s29, %s1597_s17  ;;  %p1603_p9 = scmp.lt.s32.totalorder %s1597_s17, %s1597_s17 }
  0x54   :  { %p1604_p10 = por %p1603_p9, %p1602_p8 }
  0x56   :  { %p1605_p11 = pnand %p1604_p10, %p1598_p7 }
  0x58   :  { %1608 = shalt.err (!%p1605_p11)
}
  0x59   :  { %101 = dma.hbm_to_vmem [thread:$0]  %s2359_s7, 2048, %s96_s29, [#allocation12], %s1730_s15, %s1730_s15, %s1731_s16  }
  0x5a   :  { %s1617_s4 = scalar_lea.vmem %s120_s3, 2048  ;;  %p1622_p13 = scmp.lt.s32.totalorder %s120_s3, %s120_s3 }
  0x5b   :  { %p1618_p12 = scmp.ne.s32.totalorder %s120_s3, %s1617_s4  ;;  %p1623_p0 = scmp.lt.s32.totalorder %s1617_s4, %s1617_s4 }
  0x5d   :  { %p1624_p1 = por %p1623_p0, %p1622_p13 }
  0x5f   :  { %p1625_p2 = pnand %p1624_p1, %p1618_p12 }
  0x61   :  { %1628 = shalt.err (!%p1625_p2)
}
  0x62   :  { %125 = dma.hbm_to_vmem [thread:$0]  %s2361_s9, 2048, %s120_s3, [#allocation15], %s1730_s15, %s1730_s15, %s1731_s16  }
  0x63   :  { %s1736_s20 = smov [#allocation17]  }
  0x64   :  { %s133_s21 = sshll.u32 %s1736_s20, 4  ;;  %s134_s21 = int_to_ptr.vmem [resolvable:$true] %s133_s21 }
  0x65   :  { %s1637_s22 = scalar_lea.vmem %s134_s21, 4096  ;;  %p1642_p4 = scmp.lt.s32.totalorder %s134_s21, %s134_s21 }
  0x66   :  { %p1638_p3 = scmp.ne.s32.totalorder %s134_s21, %s1637_s22  ;;  %p1643_p5 = scmp.lt.s32.totalorder %s1637_s22, %s1637_s22 }
  0x68   :  { %p1644_p6 = por %p1643_p5, %p1642_p4 }
  0x6a   :  { %p1645_p7 = pnand %p1644_p6, %p1638_p3 }
  0x6c   :  { %1648 = shalt.err (!%p1645_p7)
}
  0x6d   :  { %s1737_s7 = smov 256   ;;  %s1738_s23 = smov 16  }
  0x6e   :  { %139 = dma.hbm_to_vmem [thread:$0]  %s2363_s11, 4096, %s134_s21, [#allocation18], %s1737_s7, %s1737_s7, %s1738_s23  }
  0x6f   :  { %1709 = dma.done.wait [#allocation3], 128  }
  0x70   :  { %1710 = vsyncadd [#allocation3], 4294967168 }
  0x71   :  { %1711 = dma.done.wait [#allocation6], 256  }
  0x72   :  { %1712 = vsyncadd [#allocation6], 4294967040 }
  0x73   :  { %1713 = dma.done.wait [#allocation9], 256  }
  0x74   :  { %1714 = vsyncadd [#allocation9], 4294967040 }
  0x75   :  { %1715 = dma.done.wait [#allocation12], 2176  }
  0x76   :  { %1716 = vsyncadd [#allocation12], 4294965120 }
  0x77   :  { %1717 = dma.done.wait [#allocation15], 4096  }
  0x78   :  { %1718 = vsyncadd [#allocation15], 4294963200 }
  0x79   :  { %1719 = dma.done.wait [#allocation18], 4096  }
  0x7a   :  { %1720 = vsyncadd [#allocation18], 4294963200  ;;  %v2367_v0 = vmov 0.0   ;;  %vm1740_vm0 = vmmov 0   ;;  %v186_v1 = vld [vmem:[#allocation13 + $0x78] sm:$0xff]  ;;  %v185_v2 = vld [vmem:[#allocation13 + $0x70] sm:$0xff] }
  0x7b   :  { %1173 = vmatprep.subr.mxu0 %v2367_v0  ;;  %1208 = vmatprep.subr.mxu1 %v2367_v0  ;;  %v1864_v3 = vld [vmem:[#allocation14 + $0x78] sm:$0xff]  ;;  %v1867_v4 = vld [vmem:[#allocation14 + $0x70] sm:$0xff]  ;;  %v184_v5 = vld [vmem:[#allocation13 + $0x68] sm:$0xff]  ;;  %s1742_s8 = smov [#allocation19]  }
  0x7c   :  { %1205 = vmatprep.mubr.msk.f32.mxu0 %vm1740_vm0, %v2367_v0  ;;  %1240 = vmatprep.mubr.msk.f32.mxu1 %vm1740_vm0, %v2367_v0  ;;  %v1871_v6 = vld [vmem:[#allocation14 + $0x68] sm:$0xff]  ;;  %v183_v7 = vld [vmem:[#allocation13 + $0x60] sm:$0xff]  ;;  %v182_v9 = vld [vmem:[#allocation13 + $0x58] sm:$0xff]  ;;  %s1012_s1 = sshll.u32 %s1742_s8, 4  ;;  %s1013_s1 = int_to_ptr.vmem [resolvable:$true] %s1012_s1 }
  0x7d   :  { %1174 = vmatpush3.msra.mxu0 %v186_v1  ;;  %1209 = vmatpush3.msra.mxu1 %v1864_v3  ;;  %v1876_v8 = vld [vmem:[#allocation14 + $0x60] sm:$0xff]  ;;  %v1881_v10 = vld [vmem:[#allocation14 + $0x58] sm:$0xff]  ;;  %v181_v11 = vld [vmem:[#allocation13 + $0x50] sm:$0xff] }
  0x7e   :  { %1175 = vmatprep.subr.mxu0 %v2367_v0  ;;  %1210 = vmatprep.subr.mxu1 %v2367_v0  ;;  %v1886_v12 = vld [vmem:[#allocation14 + $0x50] sm:$0xff]  ;;  %v180_v13 = vld [vmem:[#allocation13 + $0x48] sm:$0xff]  ;;  %v179_v15 = vld [vmem:[#allocation13 + $0x40] sm:$0xff] }
  0x7f   :  { %1176 = vmatpush3.msra.mxu0 %v185_v2  ;;  %1211 = vmatpush3.msra.mxu1 %v1867_v4  ;;  %v1891_v14 = vld [vmem:[#allocation14 + $0x48] sm:$0xff]  ;;  %v1896_v16 = vld [vmem:[#allocation14 + $0x40] sm:$0xff]  ;;  %v178_v17 = vld [vmem:[#allocation13 + $0x38] sm:$0xff] }
  0x80   :  { %1177 = vmatprep.subr.mxu0 %v2367_v0  ;;  %1212 = vmatprep.subr.mxu1 %v2367_v0  ;;  %v1901_v18 = vld [vmem:[#allocation14 + $0x38] sm:$0xff]  ;;  %v177_v19 = vld [vmem:[#allocation13 + $0x30] sm:$0xff]  ;;  %v176_v21 = vld [vmem:[#allocation13 + $0x28] sm:$0xff] }
  0x81   :  { %1178 = vmatpush3.msra.mxu0 %v184_v5  ;;  %1213 = vmatpush3.msra.mxu1 %v1871_v6  ;;  %v1906_v20 = vld [vmem:[#allocation14 + $0x30] sm:$0xff]  ;;  %v1911_v22 = vld [vmem:[#allocation14 + $0x28] sm:$0xff]  ;;  %v175_v23 = vld [vmem:[#allocation13 + $0x20] sm:$0xff] }
  0x82   :  { %1179 = vmatprep.subr.mxu0 %v2367_v0  ;;  %1214 = vmatprep.subr.mxu1 %v2367_v0  ;;  %v1916_v24 = vld [vmem:[#allocation14 + $0x20] sm:$0xff]  ;;  %v174_v25 = vld [vmem:[#allocation13 + $0x18] sm:$0xff]  ;;  %v173_v27 = vld [vmem:[#allocation13 + $0x10] sm:$0xff] }
  0x83   :  { %1180 = vmatpush3.msra.mxu0 %v183_v7  ;;  %1215 = vmatpush3.msra.mxu1 %v1876_v8  ;;  %v1921_v26 = vld [vmem:[#allocation14 + $0x18] sm:$0xff]  ;;  %v1926_v28 = vld [vmem:[#allocation14 + $0x10] sm:$0xff]  ;;  %v172_v29 = vld [vmem:[#allocation13 + $0x8] sm:$0xff] }
  0x84   :  { %1181 = vmatprep.subr.mxu0 %v2367_v0  ;;  %1216 = vmatprep.subr.mxu1 %v2367_v0  ;;  %v1931_v30 = vld [vmem:[#allocation14 + $0x8] sm:$0xff]  ;;  %v171_v31 = vld [vmem:[#allocation13] sm:$0xff]  ;;  %v170_v33 = vld [vmem:[#allocation2] sm:$0xff] }
  0x85   :  { %1182 = vmatpush3.msra.mxu0 %v182_v9  ;;  %1217 = vmatpush3.msra.mxu1 %v1881_v10  ;;  %v1936_v32 = vld [vmem:[#allocation14] sm:$0xff]  ;;  %v1941_v34 = vld [vmem:[#allocation16 + $0x78] sm:$0xff]  ;;  %v1947_v36 = vld [vmem:[#allocation16 + $0x70] sm:$0xff] }
  0x86   :  { %1183 = vmatprep.subr.mxu0 %v2367_v0  ;;  %1218 = vmatprep.subr.mxu1 %v2367_v0  ;;  %v1943_v35 = vld [vmem:[#allocation5] sm:$0xff]  ;;  %v1952_v37 = vld [vmem:[#allocation16 + $0x68] sm:$0xff]  ;;  %v1959_v38 = vld [vmem:[#allocation16 + $0x60] sm:$0xff] }
  0x87   :  { %1184 = vmatpush3.msra.mxu0 %v181_v11  ;;  %1219 = vmatpush3.msra.mxu1 %v1886_v12  ;;  %2383 = vst [vmem:[#allocation31_spill] sm:$0xff] %v1943_v35  ;;  %v1963_v39 = vld [vmem:[#allocation16 + $0x58] sm:$0xff]  ;;  %v1967_v40 = vld [vmem:[#allocation16 + $0x50] sm:$0xff]  ;;  %v1971_v41 = vld [vmem:[#allocation16 + $0x48] sm:$0xff] }
  0x88   :  { %1185 = vmatprep.subr.mxu0 %v2367_v0  ;;  %1220 = vmatprep.subr.mxu1 %v2367_v0  ;;  %v1975_v42 = vld [vmem:[#allocation16 + $0x40] sm:$0xff]  ;;  %v1979_v43 = vld [vmem:[#allocation16 + $0x38] sm:$0xff]  ;;  %v1983_v44 = vld [vmem:[#allocation16 + $0x30] sm:$0xff] }
  0x89   :  { %1186 = vmatpush3.msra.mxu0 %v180_v13  ;;  %1221 = vmatpush3.msra.mxu1 %v1891_v14  ;;  %v1987_v45 = vld [vmem:[#allocation16 + $0x28] sm:$0xff]  ;;  %v1991_v46 = vld [vmem:[#allocation16 + $0x20] sm:$0xff]  ;;  %v1995_v47 = vld [vmem:[#allocation16 + $0x18] sm:$0xff] }
  0x8a   :  { %1187 = vmatprep.subr.mxu0 %v2367_v0  ;;  %1222 = vmatprep.subr.mxu1 %v2367_v0  ;;  %v1999_v48 = vld [vmem:[#allocation16 + $0x10] sm:$0xff]  ;;  %v2003_v49 = vld [vmem:[#allocation16 + $0x8] sm:$0xff]  ;;  %v2007_v50 = vld [vmem:[#allocation16] sm:$0xff] }
  0x8b   :  { %1188 = vmatpush3.msra.mxu0 %v179_v15  ;;  %1223 = vmatpush3.msra.mxu1 %v1896_v16  ;;  %v2009_v51 = vld [vmem:[#allocation7] sm:$0xff]  ;;  %v2047_v52 = vld [vmem:[#allocation8] sm:$0xff]  ;;  %v2053_v53 = vld [vmem:[#allocation17 + $0xf8] sm:$0xff] }
  0x8c   :  { %1189 = vmatprep.subr.mxu0 %v2367_v0  ;;  %1224 = vmatprep.subr.mxu1 %v2367_v0  ;;  %2384 = vst [vmem:[#allocation32_spill] sm:$0xff] %v2009_v51  ;;  %2385 = vst [vmem:[#allocation33_spill] sm:$0xff] %v2047_v52  ;;  %v2055_v54 = vld [vmem:[#allocation17 + $0xf0] sm:$0xff]  ;;  %v2057_v55 = vld [vmem:[#allocation17 + $0xe8] sm:$0xff] }
  0x8d   :  { %1190 = vmatpush3.msra.mxu0 %v178_v17  ;;  %1225 = vmatpush3.msra.mxu1 %v1901_v18  ;;  %v2060_v56 = vld [vmem:[#allocation17 + $0xe0] sm:$0xff]  ;;  %v2064_v57 = vld [vmem:[#allocation17 + $0xd8] sm:$0xff]  ;;  %v2068_v58 = vld [vmem:[#allocation17 + $0xd0] sm:$0xff] }
  0x8e   :  { %1191 = vmatprep.subr.mxu0 %v2367_v0  ;;  %1226 = vmatprep.subr.mxu1 %v2367_v0  ;;  %v2072_v59 = vld [vmem:[#allocation17 + $0xc8] sm:$0xff]  ;;  %v2076_v60 = vld [vmem:[#allocation17 + $0xc0] sm:$0xff]  ;;  %v2080_v61 = vld [vmem:[#allocation17 + $0xb8] sm:$0xff] }
  0x8f   :  { %1192 = vmatpush3.msra.mxu0 %v177_v19  ;;  %1227 = vmatpush3.msra.mxu1 %v1906_v20  ;;  %v2084_v62 = vld [vmem:[#allocation17 + $0xb0] sm:$0xff]  ;;  %v2088_v63 = vld [vmem:[#allocation17 + $0xa8] sm:$0xff]  ;;  %v2092_v1 = vld [vmem:[#allocation17 + $0xa0] sm:$0xff] }
  0x90   :  { %1193 = vmatprep.subr.mxu0 %v2367_v0  ;;  %1228 = vmatprep.subr.mxu1 %v2367_v0  ;;  %v2096_v2 = vld [vmem:[#allocation17 + $0x98] sm:$0xff]  ;;  %v2100_v5 = vld [vmem:[#allocation17 + $0x90] sm:$0xff]  ;;  %v2104_v7 = vld [vmem:[#allocation17 + $0x88] sm:$0xff] }
  0x91   :  { %1194 = vmatpush3.msra.mxu0 %v176_v21  ;;  %1229 = vmatpush3.msra.mxu1 %v1911_v22  ;;  %v1053_v17 = vld [vmem:[%s2362_s10] ss:$0 sm:$0xff] }
  0x92   :  { %1195 = vmatprep.subr.mxu0 %v2367_v0  ;;  %1230 = vmatprep.subr.mxu1 %v2367_v0 }
  0x93   :  { %1196 = vmatpush3.msra.mxu0 %v175_v23  ;;  %1231 = vmatpush3.msra.mxu1 %v1916_v24 }
  0x94   :  { %1197 = vmatprep.subr.mxu0 %v2367_v0  ;;  %1232 = vmatprep.subr.mxu1 %v2367_v0 }
  0x95   :  { %1198 = vmatpush3.msra.mxu0 %v174_v25  ;;  %1233 = vmatpush3.msra.mxu1 %v1921_v26 }
  0x96   :  { %1199 = vmatprep.subr.mxu0 %v2367_v0  ;;  %1234 = vmatprep.subr.mxu1 %v2367_v0 }
  0x97   :  { %1200 = vmatpush3.msra.mxu0 %v173_v27  ;;  %1235 = vmatpush3.msra.mxu1 %v1926_v28 }
  0x98   :  { %1201 = vmatprep.subr.mxu0 %v2367_v0  ;;  %1236 = vmatprep.subr.mxu1 %v2367_v0 }
  0x99   :  { %1202 = vmatpush3.msra.mxu0 %v172_v29  ;;  %1237 = vmatpush3.msra.mxu1 %v1931_v30  ;;  %v2119_v29 = vld [vmem:[#allocation17 + $0x80] sm:$0xff] }
  0x9a   :  { %1203 = vmatprep.subr.mxu0 %v2367_v0  ;;  %1238 = vmatprep.subr.mxu1 %v2367_v0 }
  0x9b   :  { %1204 = vmatpush3.msra.mxu0 %v171_v31  ;;  %1239 = vmatpush3.msra.mxu1 %v1936_v32  ;;  %v2122_v31 = vld [vmem:[#allocation17 + $0x78] sm:$0xff] }
  0x9c   :  { %1206 = vmatmul.mubr.f32.vlgmr.msra.gmra.mxu0 %v170_v33  ;;  %1243 = vmatprep.subr.mxu0 %v2367_v0  ;;  %v2126_v33 = vld [vmem:[#allocation17 + $0x70] sm:$0xff] }
  0x9d   :  { %1244 = vmatpush3.msra.mxu0 %v1941_v34  ;;  %1241 = vmatmul.mubr.f32.vlgmr.msra.gmra.mxu1 %v1943_v35  ;;  %v2170_v35 = vld [vmem:[#allocation17 + $0x10] sm:$0xff] }
  0x9e   :  { %1245 = vmatprep.subr.mxu0 %v2367_v0  ;;  %1275 = vmatprep.mubr.msk.f32.mxu0 %vm1740_vm0, %v2367_v0  ;;  %2394 = vst [vmem:[#allocation42_spill] sm:$0xff] %v2170_v35 }
  0x9f   :  { %1246 = vmatpush3.msra.mxu0 %v1947_v36  ;;  %541 = vmatprep.mubr.f32.mxu1 %v2367_v0 }
  0xa0   :  { %1247 = vmatprep.subr.mxu0 %v2367_v0  ;;  %477 = vmatprep.subr.mxu1 %v2053_v53 }
  0xa1   :  { %1248 = vmatpush3.msra.mxu0 %v1952_v37  ;;  %478 = vmatpush1.msra.mxu1 %v2055_v54 }
  0xa2   :  { %1249 = vmatprep.subr.mxu0 %v2367_v0  ;;  %479 = vmatprep.subr.mxu1 %v2057_v55 }
  0xa3   :  { %1250 = vmatpush3.msra.mxu0 %v1959_v38  ;;  %480 = vmatpush1.msra.mxu1 %v2060_v56 }
  0xa4   :  { %1251 = vmatprep.subr.mxu0 %v2367_v0  ;;  %481 = vmatprep.subr.mxu1 %v2064_v57 }
  0xa5   :  { %1252 = vmatpush3.msra.mxu0 %v1963_v39  ;;  %482 = vmatpush1.msra.mxu1 %v2068_v58 }
  0xa6   :  { %1253 = vmatprep.subr.mxu0 %v2367_v0  ;;  %483 = vmatprep.subr.mxu1 %v2072_v59 }
  0xa7   :  { %1254 = vmatpush3.msra.mxu0 %v1967_v40  ;;  %484 = vmatpush1.msra.mxu1 %v2076_v60 }
  0xa8   :  { %1255 = vmatprep.subr.mxu0 %v2367_v0  ;;  %485 = vmatprep.subr.mxu1 %v2080_v61 }
  0xa9   :  { %1256 = vmatpush3.msra.mxu0 %v1971_v41  ;;  %486 = vmatpush1.msra.mxu1 %v2084_v62 }
  0xaa   :  { %1257 = vmatprep.subr.mxu0 %v2367_v0  ;;  %487 = vmatprep.subr.mxu1 %v2088_v63 }
  0xab   :  { %1258 = vmatpush3.msra.mxu0 %v1975_v42  ;;  %488 = vmatpush1.msra.mxu1 %v2092_v1 }
  0xac   :  { %1259 = vmatprep.subr.mxu0 %v2367_v0  ;;  %489 = vmatprep.subr.mxu1 %v2096_v2 }
  0xad   :  { %1260 = vmatpush3.msra.mxu0 %v1979_v43  ;;  %490 = vmatpush1.msra.mxu1 %v2100_v5 }
  0xae   :  { %1261 = vmatprep.subr.mxu0 %v2367_v0  ;;  %491 = vmatprep.subr.mxu1 %v2104_v7 }
  0xaf   :  { %1262 = vmatpush3.msra.mxu0 %v1983_v44  ;;  %492 = vmatpush1.msra.mxu1 %v2119_v29 }
  0xb0   :  { %1263 = vmatprep.subr.mxu0 %v2367_v0  ;;  %493 = vmatprep.subr.mxu1 %v2122_v31 }
  0xb1   :  { %1264 = vmatpush3.msra.mxu0 %v1987_v45  ;;  %494 = vmatpush1.msra.mxu1 %v2126_v33 }
  0xb2   :  { %1265 = vmatprep.subr.mxu0 %v2367_v0 }
  0xb3   :  { %1266 = vmatpush3.msra.mxu0 %v1991_v46 }
  0xb4   :  { %1267 = vmatprep.subr.mxu0 %v2367_v0 }
  0xb5   :  { %1268 = vmatpush3.msra.mxu0 %v1995_v47 }
  0xb6   :  { %1269 = vmatprep.subr.mxu0 %v2367_v0 }
  0xb7   :  { %1270 = vmatpush3.msra.mxu0 %v1999_v48 }
  0xb8   :  { %1271 = vmatprep.subr.mxu0 %v2367_v0 }
  0xb9   :  { %1272 = vmatpush3.msra.mxu0 %v2003_v49 }
  0xba   :  { %1273 = vmatprep.subr.mxu0 %v2367_v0 }
  0xbb   :  { %1274 = vmatpush3.msra.mxu0 %v2007_v50 }
  0xbc   :  { %1276 = vmatmul.mubr.f32.vlgmr.msra.gmra.mxu0 %v2009_v51  ;;  %1278 = vmatprep.subr.mxu0 %v2367_v0  ;;  %v2174_v51 = vld [vmem:[#allocation17 + $0x8] sm:$0xff] }
  0xbd   :  { %1279 = vmatpush3.msra.mxu0 %v1864_v3  ;;  %1310 = vmatprep.mubr.msk.f32.mxu0 %vm1740_vm0, %v2367_v0 }
  0xbe   :  { %1280 = vmatprep.subr.mxu0 %v2367_v0 }
  0xbf   :  { %1281 = vmatpush3.msra.mxu0 %v1867_v4 }
  0xc0   :  { %1282 = vmatprep.subr.mxu0 %v2367_v0 }
  0xc1   :  { %1283 = vmatpush3.msra.mxu0 %v1871_v6 }
  0xc2   :  { %1284 = vmatprep.subr.mxu0 %v2367_v0 }
  0xc3   :  { %1285 = vmatpush3.msra.mxu0 %v1876_v8 }
  0xc4   :  { %1286 = vmatprep.subr.mxu0 %v2367_v0 }
  0xc5   :  { %1287 = vmatpush3.msra.mxu0 %v1881_v10 }
  0xc6   :  { %1288 = vmatprep.subr.mxu0 %v2367_v0 }
  0xc7   :  { %1289 = vmatpush3.msra.mxu0 %v1886_v12 }
  0xc8   :  { %1290 = vmatprep.subr.mxu0 %v2367_v0 }
  0xc9   :  { %1291 = vmatpush3.msra.mxu0 %v1891_v14 }
  0xca   :  { %1292 = vmatprep.subr.mxu0 %v2367_v0 }
  0xcb   :  { %1293 = vmatpush3.msra.mxu0 %v1896_v16 }
  0xcc   :  { %1294 = vmatprep.subr.mxu0 %v2367_v0 }
  0xcd   :  { %1295 = vmatpush3.msra.mxu0 %v1901_v18 }
  0xce   :  { %1296 = vmatprep.subr.mxu0 %v2367_v0 }
  0xcf   :  { %1297 = vmatpush3.msra.mxu0 %v1906_v20 }
  0xd0   :  { %1298 = vmatprep.subr.mxu0 %v2367_v0 }
  0xd1   :  { %1299 = vmatpush3.msra.mxu0 %v1911_v22 }
  0xd2   :  { %1300 = vmatprep.subr.mxu0 %v2367_v0 }
  0xd3   :  { %1301 = vmatpush3.msra.mxu0 %v1916_v24 }
  0xd4   :  { %1302 = vmatprep.subr.mxu0 %v2367_v0 }
  0xd5   :  { %1303 = vmatpush3.msra.mxu0 %v1921_v26 }
  0xd6   :  { %1304 = vmatprep.subr.mxu0 %v2367_v0 }
  0xd7   :  { %1305 = vmatpush3.msra.mxu0 %v1926_v28 }
  0xd8   :  { %1306 = vmatprep.subr.mxu0 %v2367_v0 }
  0xd9   :  { %1307 = vmatpush3.msra.mxu0 %v1931_v30 }
  0xda   :  { %1308 = vmatprep.subr.mxu0 %v2367_v0 }
  0xdb   :  { %1309 = vmatpush3.msra.mxu0 %v1936_v32 }
  0xdc   :  { %1311 = vmatmul.mubr.f32.vlgmr.msra.gmra.mxu0 %v2047_v52  ;;  %703 = vmatprep.subr.mxu0 %v2053_v53  ;;  %v2162_v52 = vld [vmem:[#allocation17 + $0x20] sm:$0xff] }
  0xdd   :  { %767 = vmatprep.mubr.f32.mxu0 %v2367_v0  ;;  %704 = vmatpush1.msra.mxu0 %v2055_v54  ;;  %v2158_v0 = vld [vmem:[#allocation17 + $0x28] sm:$0xff]  ;;  %2392 = vst [vmem:[#allocation40_spill] sm:$0xff] %v2162_v52 }
  0xde   :  { %705 = vmatprep.subr.mxu0 %v2057_v55  ;;  %2391 = vst [vmem:[#allocation39_spill] sm:$0xff] %v2158_v0 }
  0xdf   :  { %706 = vmatpush1.msra.mxu0 %v2060_v56 }
  0xe0   :  { %707 = vmatprep.subr.mxu0 %v2064_v57 }
  0xe1   :  { %708 = vmatpush1.msra.mxu0 %v2068_v58 }
  0xe2   :  { %709 = vmatprep.subr.mxu0 %v2072_v59 }
  0xe3   :  { %710 = vmatpush1.msra.mxu0 %v2076_v60 }
  0xe4   :  { %711 = vmatprep.subr.mxu0 %v2080_v61 }
  0xe5   :  { %712 = vmatpush1.msra.mxu0 %v2084_v62 }
  0xe6   :  { %713 = vmatprep.subr.mxu0 %v2088_v63 }
  0xe7   :  { %714 = vmatpush1.msra.mxu0 %v2092_v1 }
  0xe8   :  { %715 = vmatprep.subr.mxu0 %v2096_v2 }
  0xe9   :  { %716 = vmatpush1.msra.mxu0 %v2100_v5 }
  0xea   :  { %717 = vmatprep.subr.mxu0 %v2104_v7 }
  0xeb   :  { %718 = vmatpush1.msra.mxu0 %v2119_v29 }
  0xec   :  { %719 = vmatprep.subr.mxu0 %v2122_v31 }
  0xed   :  { %720 = vmatpush1.msra.mxu0 %v2126_v33 }
 0x15c   :  { %v260_v9 = vpop.f32.mrf.mxu0 }
 0x15d   :  { %v396_v11 = vpop.f32.mrf.mxu1  ;;  %v2116_v19 = vadd.f32 %v1053_v17, %v260_v9  ;;  %v2130_v9 = vld [vmem:[#allocation17 + $0x68] sm:$0xff] }
 0x15e   :  { %v1207_v13 = vpop.f32.mrf.mxu0  ;;  %495 = vmatprep.subr.mxu1 %v2130_v9  ;;  %721 = vmatprep.subr.mxu0 %v2130_v9  ;;  %v2142_v17 = vld [vmem:[#allocation17 + $0x48] sm:$0xff] }
 0x15f   :  { %v1242_v15 = vpop.f32.mrf.mxu1  ;;  %2386 = vst [vmem:[#allocation34_spill] sm:$0xff] %v2116_v19  ;;  %v400_v21 = vadd.f32 %v396_v11, %v2116_v19  ;;  %v2134_v11 = vld [vmem:[#allocation17 + $0x60] sm:$0xff]  ;;  %v2138_v13 = vld [vmem:[#allocation17 + $0x58] sm:$0xff]  ;;  %2387 = vst [vmem:[#allocation35_spill] sm:$0xff] %v2142_v17 }
 0x160   :  { %496 = vmatpush1.msra.mxu1 %v2134_v11  ;;  %v2140_v15 = vld [vmem:[#allocation17 + $0x50] sm:$0xff]  ;;  %722 = vmatpush1.msra.mxu0 %v2134_v11  ;;  %v2166_v19 = vld [vmem:[#allocation17 + $0x18] sm:$0xff] }
 0x161   :  { %497 = vmatprep.subr.mxu1 %v2138_v13  ;;  %723 = vmatprep.subr.mxu0 %v2138_v13  ;;  %2393 = vst [vmem:[#allocation41_spill] sm:$0xff] %v2166_v19 }
 0x162   :  { %498 = vmatpush1.msra.mxu1 %v2140_v15  ;;  %724 = vmatpush1.msra.mxu0 %v2140_v15 }
 0x163   :  { %499 = vmatprep.subr.mxu1 %v2142_v17  ;;  %725 = vmatprep.subr.mxu0 %v2142_v17 }
 0x17c   :  { %v467_v23 = vpop.f32.mrf.mxu0 }
 0x17d   :  { %v471_v25 = vadd.f32 %v467_v23, %v400_v21  ;;  %v2146_v21 = vld [vmem:[#allocation17 + $0x40] sm:$0xff]  ;;  %v2150_v23 = vld [vmem:[#allocation17 + $0x38] sm:$0xff] }
 0x17e   :  { %v1277_v27 = vpop.f32.mrf.mxu0  ;;  %2388 = vst [vmem:[#allocation36_spill] sm:$0xff] %v2146_v21  ;;  %2389 = vst [vmem:[#allocation37_spill] sm:$0xff] %v2150_v23  ;;  %500 = vmatpush1.msra.mxu1 %v2146_v21  ;;  %726 = vmatpush1.msra.mxu0 %v2146_v21 }
 0x17f   :  { %472 = vmax.xlane.f32.xlu0 %v471_v25  ;;  %v2154_v27 = vld [vmem:[#allocation17 + $0x30] sm:$0xff]  ;;  %501 = vmatprep.subr.mxu1 %v2150_v23 }
 0x180   :  { %2390 = vst [vmem:[#allocation38_spill] sm:$0xff] %v2154_v27  ;;  %727 = vmatprep.subr.mxu0 %v2150_v23  ;;  %502 = vmatpush1.msra.mxu1 %v2154_v27  ;;  %v2178_v23 = vld [vmem:[#allocation17] sm:$0xff] }
 0x181   :  { %728 = vmatpush1.msra.mxu0 %v2154_v27  ;;  %503 = vmatprep.subr.mxu1 %v2158_v0 }
 0x182   :  { %729 = vmatprep.subr.mxu0 %v2158_v0  ;;  %504 = vmatpush1.msra.mxu1 %v2162_v52  ;;  %v2395_v0 = vmov 0.0  }
 0x183   :  { %730 = vmatpush1.msra.mxu0 %v2162_v52  ;;  %505 = vmatprep.subr.mxu1 %v2166_v19 }
 0x184   :  { %731 = vmatprep.subr.mxu0 %v2166_v19  ;;  %506 = vmatpush1.msra.mxu1 %v2170_v35 }
 0x185   :  { %732 = vmatpush1.msra.mxu0 %v2170_v35  ;;  %507 = vmatprep.subr.mxu1 %v2174_v51 }
 0x186   :  { %733 = vmatprep.subr.mxu0 %v2174_v51  ;;  %508 = vmatpush1.msra.mxu1 %v2178_v23 }
 0x187   :  { %734 = vmatpush1.msra.mxu0 %v2178_v23  ;;  %1313 = vmatprep.subr.mxu1 %v2395_v0 }
 0x188   :  { %1383 = vmatprep.subr.mxu0 %v2395_v0 }
 0x19c   :  { %v2189_v52 = vpop.f32.mrf.mxu0 }
 0x19e   :  { %v1312_v27 = vpop.f32.mrf.mxu0 }
 0x208   :  { %v473_v19 = vpop.xlane.xlu0 %472 }
 0x209   :  { %v474_v21 = vsub.f32 %v471_v25, %v473_v19 }
 0x20b   :  { %v475_v17 = vmul.f32 1.442695, %v474_v21 }
 0x20d   :  { %1437 = vpow2.f32 %v475_v17 }
 0x21a   :  { %v1438_v35 = vpop.eup %1437 }
 0x21b   :  { %542 = vmatmul.mubr.f32.vlgmr.msra.gmra.mxu1 %v1438_v35  ;;  %v2222_v35 = vld [vmem:[#allocation10] sm:$0xff] }
 0x21c   :  { %1314 = vmatpush3.msra.mxu1 %v1941_v34  ;;  %1345 = vmatprep.mubr.msk.f32.mxu1 %vm1740_vm0, %v2395_v0 }
 0x21d   :  { %1315 = vmatprep.subr.mxu1 %v2395_v0 }
 0x21e   :  { %1316 = vmatpush3.msra.mxu1 %v1947_v36 }
 0x21f   :  { %1317 = vmatprep.subr.mxu1 %v2395_v0 }
 0x220   :  { %1318 = vmatpush3.msra.mxu1 %v1952_v37 }
 0x221   :  { %1319 = vmatprep.subr.mxu1 %v2395_v0 }
 0x222   :  { %1320 = vmatpush3.msra.mxu1 %v1959_v38 }
 0x223   :  { %1321 = vmatprep.subr.mxu1 %v2395_v0 }
 0x224   :  { %1322 = vmatpush3.msra.mxu1 %v1963_v39 }
 0x225   :  { %1323 = vmatprep.subr.mxu1 %v2395_v0 }
 0x226   :  { %1324 = vmatpush3.msra.mxu1 %v1967_v40 }
 0x227   :  { %1325 = vmatprep.subr.mxu1 %v2395_v0 }
 0x228   :  { %1326 = vmatpush3.msra.mxu1 %v1971_v41 }
 0x229   :  { %1327 = vmatprep.subr.mxu1 %v2395_v0 }
 0x22a   :  { %1328 = vmatpush3.msra.mxu1 %v1975_v42 }
 0x22b   :  { %1329 = vmatprep.subr.mxu1 %v2395_v0 }
 0x22c   :  { %1330 = vmatpush3.msra.mxu1 %v1979_v43 }
 0x22d   :  { %1331 = vmatprep.subr.mxu1 %v2395_v0 }
 0x22e   :  { %1332 = vmatpush3.msra.mxu1 %v1983_v44 }
 0x22f   :  { %1333 = vmatprep.subr.mxu1 %v2395_v0 }
 0x230   :  { %1334 = vmatpush3.msra.mxu1 %v1987_v45 }
 0x231   :  { %1335 = vmatprep.subr.mxu1 %v2395_v0 }
 0x232   :  { %1336 = vmatpush3.msra.mxu1 %v1991_v46 }
 0x233   :  { %1337 = vmatprep.subr.mxu1 %v2395_v0 }
 0x234   :  { %1338 = vmatpush3.msra.mxu1 %v1995_v47 }
 0x235   :  { %1339 = vmatprep.subr.mxu1 %v2395_v0 }
 0x236   :  { %1340 = vmatpush3.msra.mxu1 %v1999_v48 }
 0x237   :  { %1341 = vmatprep.subr.mxu1 %v2395_v0 }
 0x238   :  { %1342 = vmatpush3.msra.mxu1 %v2003_v49 }
 0x239   :  { %1343 = vmatprep.subr.mxu1 %v2395_v0 }
 0x23a   :  { %1344 = vmatpush3.msra.mxu1 %v2007_v50 }
 0x23b   :  { %1346 = vmatmul.mubr.f32.vlgmr.msra.gmra.mxu1 %v2222_v35  ;;  %1348 = vmatprep.subr.mxu1 %v2395_v0 }
 0x23c   :  { %1349 = vmatpush3.msra.mxu1 %v1864_v3  ;;  %1380 = vmatprep.mubr.msk.f32.mxu1 %vm1740_vm0, %v2395_v0  ;;  %v2262_v3 = vld [vmem:[%s2357_s5] sm:$0xff]  ;;  %s1741_s5 = smov [#allocation20]  }
 0x23d   :  { %1350 = vmatprep.subr.mxu1 %v2395_v0  ;;  %s1022_s16 = sshll.u32 %s1741_s5, 4  ;;  %s1023_s16 = int_to_ptr.vmem [resolvable:$true] %s1022_s16 }
 0x23e   :  { %1351 = vmatpush3.msra.mxu1 %v1867_v4  ;;  %v2396_v4 = vld [vmem:[#allocation35_spill] sm:$0xff]  ;;  %s1649_s26 = scalar_lea.vmem %s1023_s16, 128  ;;  %p1654_p9 = scmp.lt.s32.totalorder %s1023_s16, %s1023_s16 }
 0x23f   :  { %1352 = vmatprep.subr.mxu1 %v2395_v0  ;;  %p1650_p8 = scmp.ne.s32.totalorder %s1023_s16, %s1649_s26  ;;  %p1655_p10 = scmp.lt.s32.totalorder %s1649_s26, %s1649_s26 }
 0x240   :  { %1353 = vmatpush3.msra.mxu1 %v1871_v6  ;;  %v2397_v6 = vld [vmem:[#allocation36_spill] sm:$0xff] }
 0x241   :  { %1354 = vmatprep.subr.mxu1 %v2395_v0  ;;  %p1656_p11 = por %p1655_p10, %p1654_p9 }
 0x242   :  { %1355 = vmatpush3.msra.mxu1 %v1876_v8  ;;  %v2398_v8 = vld [vmem:[#allocation37_spill] sm:$0xff] }
 0x243   :  { %1356 = vmatprep.subr.mxu1 %v2395_v0  ;;  %p1657_p12 = pnand %p1656_p11, %p1650_p8 }
 0x244   :  { %1357 = vmatpush3.msra.mxu1 %v1881_v10  ;;  %v2399_v10 = vld [vmem:[#allocation38_spill] sm:$0xff] }
 0x245   :  { %1358 = vmatprep.subr.mxu1 %v2395_v0 }
 0x246   :  { %1359 = vmatpush3.msra.mxu1 %v1886_v12  ;;  %v2400_v12 = vld [vmem:[#allocation39_spill] sm:$0xff] }
 0x247   :  { %1360 = vmatprep.subr.mxu1 %v2395_v0 }
 0x248   :  { %1361 = vmatpush3.msra.mxu1 %v1891_v14  ;;  %v2401_v14 = vld [vmem:[#allocation40_spill] sm:$0xff] }
 0x249   :  { %1362 = vmatprep.subr.mxu1 %v2395_v0 }
 0x24a   :  { %1363 = vmatpush3.msra.mxu1 %v1896_v16  ;;  %v2402_v16 = vld [vmem:[#allocation41_spill] sm:$0xff] }
 0x24b   :  { %1364 = vmatprep.subr.mxu1 %v2395_v0 }
 0x24c   :  { %1365 = vmatpush3.msra.mxu1 %v1901_v18  ;;  %v2403_v18 = vld [vmem:[#allocation42_spill] sm:$0xff] }
 0x24d   :  { %1366 = vmatprep.subr.mxu1 %v2395_v0 }
 0x24e   :  { %1367 = vmatpush3.msra.mxu1 %v1906_v20 }
 0x24f   :  { %1368 = vmatprep.subr.mxu1 %v2395_v0 }
 0x250   :  { %1369 = vmatpush3.msra.mxu1 %v1911_v22 }
 0x251   :  { %1370 = vmatprep.subr.mxu1 %v2395_v0 }
 0x252   :  { %1371 = vmatpush3.msra.mxu1 %v1916_v24  ;;  %v2404_v24 = vld [vmem:[#allocation32_spill] sm:$0xff] }
 0x253   :  { %1372 = vmatprep.subr.mxu1 %v2395_v0 }
 0x254   :  { %1373 = vmatpush3.msra.mxu1 %v1921_v26  ;;  %v2405_v26 = vld [vmem:[#allocation31_spill] sm:$0xff] }
 0x255   :  { %1374 = vmatprep.subr.mxu1 %v2395_v0 }
 0x256   :  { %1375 = vmatpush3.msra.mxu1 %v1926_v28  ;;  %v550_v28 = vsub.f32 %v2405_v26, %v2404_v24 }
 0x257   :  { %1376 = vmatprep.subr.mxu1 %v2395_v0 }
 0x258   :  { %1377 = vmatpush3.msra.mxu1 %v1931_v30 }
 0x259   :  { %1378 = vmatprep.subr.mxu1 %v2395_v0 }
 0x25a   :  { %1379 = vmatpush3.msra.mxu1 %v1936_v32 }
 0x25b   :  { %1381 = vmatmul.mubr.f32.vlgmr.msra.gmra.mxu1 %v2262_v3  ;;  %929 = vmatprep.subr.mxu1 %v2053_v53 }
 0x25c   :  { %930 = vmatpush1.msra.mxu1 %v2055_v54  ;;  %993 = vmatprep.mubr.f32.mxu1 %v2395_v0 }
 0x25d   :  { %931 = vmatprep.subr.mxu1 %v2057_v55  ;;  %v2406_v55 = vld [vmem:[#allocation34_spill] sm:$0xff] }
 0x25e   :  { %932 = vmatpush1.msra.mxu1 %v2060_v56  ;;  %v626_v56 = vadd.f32 %v2189_v52, %v2406_v55 }
 0x25f   :  { %933 = vmatprep.subr.mxu1 %v2064_v57 }
 0x260   :  { %934 = vmatpush1.msra.mxu1 %v2068_v58 }
 0x261   :  { %935 = vmatprep.subr.mxu1 %v2072_v59 }
 0x262   :  { %936 = vmatpush1.msra.mxu1 %v2076_v60 }
 0x263   :  { %937 = vmatprep.subr.mxu1 %v2080_v61 }
 0x264   :  { %938 = vmatpush1.msra.mxu1 %v2084_v62 }
 0x265   :  { %939 = vmatprep.subr.mxu1 %v2088_v63 }
 0x266   :  { %940 = vmatpush1.msra.mxu1 %v2092_v1 }
 0x267   :  { %941 = vmatprep.subr.mxu1 %v2096_v2 }
 0x268   :  { %942 = vmatpush1.msra.mxu1 %v2100_v5 }
 0x269   :  { %943 = vmatprep.subr.mxu1 %v2104_v7 }
 0x26a   :  { %944 = vmatpush1.msra.mxu1 %v2119_v29 }
 0x26b   :  { %945 = vmatprep.subr.mxu1 %v2122_v31 }
 0x26c   :  { %946 = vmatpush1.msra.mxu1 %v2126_v33 }
 0x26d   :  { %947 = vmatprep.subr.mxu1 %v2130_v9 }
 0x26e   :  { %948 = vmatpush1.msra.mxu1 %v2134_v11 }
 0x26f   :  { %949 = vmatprep.subr.mxu1 %v2138_v13 }
 0x270   :  { %950 = vmatpush1.msra.mxu1 %v2140_v15 }
 0x271   :  { %951 = vmatprep.subr.mxu1 %v2396_v4 }
 0x272   :  { %952 = vmatpush1.msra.mxu1 %v2397_v6 }
 0x273   :  { %953 = vmatprep.subr.mxu1 %v2398_v8 }
 0x274   :  { %954 = vmatpush1.msra.mxu1 %v2399_v10 }
 0x275   :  { %955 = vmatprep.subr.mxu1 %v2400_v12 }
 0x276   :  { %956 = vmatpush1.msra.mxu1 %v2401_v14 }
 0x277   :  { %957 = vmatprep.subr.mxu1 %v2402_v16 }
 0x278   :  { %958 = vmatpush1.msra.mxu1 %v2403_v18 }
 0x279   :  { %959 = vmatprep.subr.mxu1 %v2174_v51 }
 0x27a   :  { %960 = vmatpush1.msra.mxu1 %v2178_v23 }
 0x2db   :  { %v543_v20 = vpop.f32.mrf.mxu1 }
 0x2dd   :  { %v545_v22 = vpop.f32.mrf.mxu1 }
 0x2de   :  { %1439 = vrcp.f32 %v545_v22 }
 0x2eb   :  { %v1440_v30 = vpop.eup %1439 }
 0x2ec   :  { %v549_v32 = vmul.f32 %v1440_v30, %v543_v20 }
 0x2ee   :  { %v551_v53 = vmul.f32 %v550_v28, %v549_v32 }
 0x2f0   :  { %v552_v54 = vadd.f32 %v551_v53, %v2404_v24 }
 0x2f2   :  { %553 = vst [vmem:[#allocation19] sm:$0xff] %v552_v54 }
 0x2fb   :  { %v693_v57 = vpop.f32.mrf.mxu1 }
 0x2fc   :  { %v697_v58 = vadd.f32 %v693_v57, %v626_v56 }
 0x2fd   :  { %v1347_v51 = vpop.f32.mrf.mxu1 }
 0x2fe   :  { %698 = vmax.xlane.f32.xlu0 %v697_v58 }
 0x31b   :  { %v848_v59 = vpop.f32.mrf.mxu1 }
 0x31d   :  { %v1382_v60 = vpop.f32.mrf.mxu1 }
 0x387   :  { %v699_v61 = vpop.xlane.xlu0 %698 }
 0x388   :  { %v700_v62 = vsub.f32 %v697_v58, %v699_v61 }
 0x38a   :  { %v701_v63 = vmul.f32 1.442695, %v700_v62 }
 0x38c   :  { %1441 = vpow2.f32 %v701_v63 }
 0x399   :  { %v1442_v1 = vpop.eup %1441 }
 0x39a   :  { %768 = vmatmul.mubr.f32.vlgmr.msra.gmra.mxu0 %v1442_v1 }
 0x39b   :  { %1384 = vmatpush3.msra.mxu0 %v1941_v34  ;;  %1415 = vmatprep.mubr.msk.f32.mxu0 %vm1740_vm0, %v2395_v0  ;;  %v781_v34 = vld [vmem:[#allocation11] sm:$0xff] }
 0x39c   :  { %1385 = vmatprep.subr.mxu0 %v2395_v0 }
 0x39d   :  { %1386 = vmatpush3.msra.mxu0 %v1947_v36 }
 0x39e   :  { %1387 = vmatprep.subr.mxu0 %v2395_v0 }
 0x39f   :  { %1388 = vmatpush3.msra.mxu0 %v1952_v37 }
 0x3a0   :  { %1389 = vmatprep.subr.mxu0 %v2395_v0 }
 0x3a1   :  { %1390 = vmatpush3.msra.mxu0 %v1959_v38  ;;  %v2407_v38 = vld [vmem:[#allocation33_spill] sm:$0xff] }
 0x3a2   :  { %1391 = vmatprep.subr.mxu0 %v2395_v0 }
 0x3a3   :  { %1392 = vmatpush3.msra.mxu0 %v1963_v39  ;;  %v776_v39 = vsub.f32 %v2407_v38, %v2222_v35 }
 0x3a4   :  { %1393 = vmatprep.subr.mxu0 %v2395_v0 }
 0x3a5   :  { %1394 = vmatpush3.msra.mxu0 %v1967_v40 }
 0x3a6   :  { %1395 = vmatprep.subr.mxu0 %v2395_v0 }
 0x3a7   :  { %1396 = vmatpush3.msra.mxu0 %v1971_v41 }
 0x3a8   :  { %1397 = vmatprep.subr.mxu0 %v2395_v0 }
 0x3a9   :  { %1398 = vmatpush3.msra.mxu0 %v1975_v42 }
 0x3aa   :  { %1399 = vmatprep.subr.mxu0 %v2395_v0 }
 0x3ab   :  { %1400 = vmatpush3.msra.mxu0 %v1979_v43 }
 0x3ac   :  { %1401 = vmatprep.subr.mxu0 %v2395_v0 }
 0x3ad   :  { %1402 = vmatpush3.msra.mxu0 %v1983_v44  ;;  %v852_v44 = vadd.f32 %v848_v59, %v2406_v55 }
 0x3ae   :  { %1403 = vmatprep.subr.mxu0 %v2395_v0 }
 0x3af   :  { %1404 = vmatpush3.msra.mxu0 %v1987_v45 }
 0x3b0   :  { %1405 = vmatprep.subr.mxu0 %v2395_v0 }
 0x3b1   :  { %1406 = vmatpush3.msra.mxu0 %v1991_v46 }
 0x3b2   :  { %1407 = vmatprep.subr.mxu0 %v2395_v0 }
 0x3b3   :  { %1408 = vmatpush3.msra.mxu0 %v1995_v47 }
 0x3b4   :  { %1409 = vmatprep.subr.mxu0 %v2395_v0 }
 0x3b5   :  { %1410 = vmatpush3.msra.mxu0 %v1999_v48 }
 0x3b6   :  { %1411 = vmatprep.subr.mxu0 %v2395_v0 }
 0x3b7   :  { %1412 = vmatpush3.msra.mxu0 %v2003_v49 }
 0x3b8   :  { %1413 = vmatprep.subr.mxu0 %v2395_v0 }
 0x3b9   :  { %1414 = vmatpush3.msra.mxu0 %v2007_v50 }
 0x3ba   :  { %1416 = vmatmul.mubr.f32.vlgmr.msra.gmra.mxu0 %v781_v34 }
 0x45a   :  { %v769_v36 = vpop.f32.mrf.mxu0 }
 0x45c   :  { %v771_v37 = vpop.f32.mrf.mxu0 }
 0x45d   :  { %1443 = vrcp.f32 %v771_v37 }
 0x46a   :  { %v1444_v40 = vpop.eup %1443 }
 0x46b   :  { %v775_v41 = vmul.f32 %v1444_v40, %v769_v36 }
 0x46d   :  { %v777_v42 = vmul.f32 %v776_v39, %v775_v41 }
 0x46f   :  { %v778_v43 = vadd.f32 %v777_v42, %v2222_v35 }
 0x471   :  { %779 = vst [vmem:[#allocation20] sm:$0xff] %v778_v43 }
 0x47a   :  { %v919_v45 = vpop.f32.mrf.mxu0 }
 0x47b   :  { %v923_v46 = vadd.f32 %v919_v45, %v852_v44 }
 0x47c   :  { %v1417_v0 = vpop.f32.mrf.mxu0 }
 0x47d   :  { %924 = vmax.xlane.f32.xlu1 %v923_v46 }
 0x506   :  { %v925_v47 = vpop.xlane.xlu1 %924 }
 0x507   :  { %v926_v48 = vsub.f32 %v923_v46, %v925_v47 }
 0x509   :  { %v927_v49 = vmul.f32 1.442695, %v926_v48 }
 0x50b   :  { %1445 = vpow2.f32 %v927_v49 }
 0x518   :  { %v1446_v50 = vpop.eup %1445 }
 0x519   :  { %994 = vmatmul.mubr.f32.vlgmr.msra.gmra.mxu1 %v1446_v50 }
 0x51a   :  { %1660 = shalt.err (!%p1657_p12)
}
 0x51b   :  { %1025 = dma.vmem_to_hbm [thread:$0]  %s1023_s16, 128, %s2365_s13, [#allocation21]  }
 0x51c   :  { %s1669_s28 = scalar_lea.vmem %s1013_s1, 128  ;;  %p1674_p0 = scmp.lt.s32.totalorder %s1013_s1, %s1013_s1 }
 0x51d   :  { %p1670_p13 = scmp.ne.s32.totalorder %s1013_s1, %s1669_s28  ;;  %p1675_p1 = scmp.lt.s32.totalorder %s1669_s28, %s1669_s28 }
 0x51f   :  { %p1676_p2 = por %p1675_p1, %p1674_p0 }
 0x521   :  { %p1677_p3 = pnand %p1676_p2, %p1670_p13 }
 0x523   :  { %1680 = shalt.err (!%p1677_p3)
}
 0x524   :  { %1015 = dma.vmem_to_hbm [thread:$0]  %s1013_s1, 128, %s2364_s12, [#allocation4]   ;;  %v1002_v5 = vsub.f32 %v2262_v3, %v781_v34 }
 0x525   :  { %s1743_s3 = smov [#allocation22]  }
 0x526   :  { %s1032_s13 = sshll.u32 %s1743_s3, 4  ;;  %s1033_s13 = int_to_ptr.vmem [resolvable:$true] %s1032_s13 }
 0x527   :  { %s1689_s17 = scalar_lea.vmem %s1033_s13, 128  ;;  %p1694_p5 = scmp.lt.s32.totalorder %s1033_s13, %s1033_s13 }
 0x528   :  { %p1690_p4 = scmp.ne.s32.totalorder %s1033_s13, %s1689_s17  ;;  %p1695_p6 = scmp.lt.s32.totalorder %s1689_s17, %s1689_s17 }
 0x52a   :  { %p1696_p7 = por %p1695_p6, %p1694_p5 }
 0x52c   :  { %p1697_p8 = pnand %p1696_p7, %p1690_p4 }
 0x5d9   :  { %v995_v52 = vpop.f32.mrf.mxu1 }
 0x5db   :  { %v997_v2 = vpop.f32.mrf.mxu1 }
 0x5dc   :  { %1447 = vrcp.f32 %v997_v2 }
 0x5e9   :  { %v1448_v7 = vpop.eup %1447 }
 0x5ea   :  { %v1001_v19 = vmul.f32 %v1448_v7, %v995_v52 }
 0x5ec   :  { %v1003_v25 = vmul.f32 %v1002_v5, %v1001_v19 }
 0x5ee   :  { %v1004_v29 = vadd.f32 %v1003_v25, %v781_v34 }
 0x5f0   :  { %1005 = vst [vmem:[#allocation22] sm:$0xff] %v1004_v29 }
 0x5f1   :  { %1700 = shalt.err (!%p1697_p8)
}
 0x5f2   :  { %1035 = dma.vmem_to_hbm [thread:$0]  %s1033_s13, 128, %s2366_s14, [#allocation21]  }
 0x5f3   :  { %1721 = dma.done.wait [#allocation4], 128  }
 0x5f4   :  { %1722 = vsyncadd [#allocation4], 4294967168 }
 0x5f5   :  { %1723 = dma.done.wait [#allocation21], 256  }
 0x5f6   :  { %1724 = vsyncadd [#allocation21], 4294967040 }
 0x5f7   :  { %1045 = vsyncpa [#allocation3], 1 }
 0x5f8   :  { %1046 = vsyncpa [#allocation6], 1 }
 0x5f9   :  { %1047 = vsyncpa [#allocation9], 1 }
 0x5fa   :  { %1048 = vsyncpa [#allocation12], 1 }
 0x5fb   :  { %1049 = vsyncpa [#allocation15], 1 }
 0x5fc   :  { %1050 = vsyncpa [#allocation18], 1 }
 0x5fd   :  { %1051 = vsyncpa [#allocation4], 1 }
 0x5fe   :  { %1052 = vsyncpa [#allocation21], 1 }

</bundles_post_ra>
